<compile_context>
chip_gen: v6e
topology: v6e:2x2x1
jax: 0.10.0
libtpu: 0.0.40
codegen_flags: <defaults>
</compile_context>

<pallas_src>
import functools

import jax
import jax.numpy as jnp
from jax.experimental import pallas as pl
from jax.experimental.pallas import tpu as pltpu


_LANE = 128
_COMPUTE_DTYPE = jnp.bfloat16   # streamed / MXU dtype; accumulation stays f32
_MiB = 1024 * 1024


# ------------------------------- small helpers ------------------------------ #
def _round_up(x, m):
    return ((x + m - 1) // m) * m


def _pad_cols(a, target):
    pad = target - a.shape[-1]
    if pad == 0:
        return a
    return jnp.pad(a, [(0, 0)] * (a.ndim - 1) + [(0, pad)])


def _pad_rows(a, target):
    pad = target - a.shape[0]
    if pad == 0:
        return a
    return jnp.pad(a, [(0, pad)] + [(0, 0)] * (a.ndim - 1))


def _vmem_capacity_bytes():
    """Per-core VMEM capacity; conservative 64 MiB fallback (v7x-sized) if query fails."""
    try:
        cap = getattr(pltpu.get_tpu_info(), "vmem_capacity_bytes", None)
        if cap:
            return int(cap)
    except Exception:
        pass
    return 64 * _MiB


def _vmem_estimate(tm, k0, w_shapes, n_out):
    """Rough per-grid-step VMEM footprint.

    x (f32, double-buffered) + out (f32, double-buffered) + params (double-buffered by the
    pipeliner even though their index_maps are constant) + headroom for in-kernel f32/bf16
    intermediates.
    """
    x_b = tm * k0 * 4
    o_b = tm * n_out * 4
    w_b = sum(k * n * 2 + n * 4 for (k, n) in w_shapes)
    inter_b = 3 * tm * max(n for _, n in w_shapes) * 4
    return 2 * (x_b + o_b) + 2 * w_b + inter_b


# ------------------------------ one-time packing ----------------------------- #
def pack_mlp_params(weights, biases):
    """Pad + cast parameters ONCE (module-init style), outside the jitted forward.

    weights: list of (K_i, N_i) f32 in `x @ W` orientation.  Layer 0 keeps its K
    unpadded (matches the unpadded x stream); the final layer keeps its N unpadded
    (matches the unpadded output store); hidden dims are zero-padded to 128 so every
    intermediate GEMM is lane-dense.  Zero padding propagates exactly through
    W(pad=0) + b(pad=0) + ReLU, so no slicing is ever needed.
    """
    num_layers = len(weights)
    dims = [weights[0].shape[0]] + [w.shape[1] for w in weights]
    for i, w in enumerate(weights):
        assert w.shape[0] == dims[i], (w.shape, dims[i])

    pk = [dims[0]] + [_round_up(d, _LANE) for d in dims[1:]]          # K padding per layer
    pn = [_round_up(d, _LANE) for d in dims[1:-1]] + [dims[-1]]       # N padding per layer

    ws, bs = [], []
    for i in range(num_layers):
        wp = _pad_cols(_pad_rows(weights[i], pk[i]), pn[i]).astype(_COMPUTE_DTYPE)
        bp = _pad_cols(biases[i].reshape(1, -1), pn[i]).astype(jnp.float32)
        ws.append(wp)
        bs.append(bp)
    return tuple(ws), tuple(bs)


# ------------------------------- Pallas kernel ------------------------------ #
def _make_mlp_kernel(num_layers, relu_flags):
    """Fused multi-layer kernel.  refs = (x, w0, b0, ..., w_{L-1}, b_{L-1}, out)."""

    def kernel(*refs):
        x_ref = refs[0]
        o_ref = refs[-1]
        h = x_ref[...].astype(_COMPUTE_DTYPE)                          # f32->bf16 on VPU, in-kernel
        for li in range(num_layers):                                   # unrolled (static)
            w_ref = refs[1 + 2 * li]
            b_ref = refs[2 + 2 * li]
            acc = jnp.dot(h, w_ref[...],
                          preferred_element_type=jnp.float32)          # MXU, f32 accumulate
            acc = acc + b_ref[...]                                      # f32 bias add
            if relu_flags[li]:
                acc = jnp.maximum(acc, 0.0)                             # f32 ReLU
            if li + 1 < num_layers:
                h = acc.astype(_COMPUTE_DTYPE)                          # bf16 for next MXU pass
            else:
                o_ref[...] = acc.astype(o_ref.dtype)                    # unpadded store

    return kernel


# ---------------------------------- wrapper --------------------------------- #
@functools.partial(jax.jit, static_argnames=("relu_flags", "tm_max"))
def mlp_forward(x, packed_weights, packed_biases, relu_flags, tm_max=2048):
    """MLP forward (norm=False, dropout=identity), using pre-packed params.

    x:              (..., in_features) float32, unpadded.
    packed_weights: tuple from pack_mlp_params (bf16, hidden dims padded to 128).
    packed_biases:  tuple from pack_mlp_params (f32, shape (1, N_padded)).
    relu_flags:     tuple of bool (True for LinearBlock layers, False for final classifier).
    returns (..., num_classes) float32.
    """
    num_layers = len(packed_weights)
    assert len(packed_biases) == num_layers and len(relu_flags) == num_layers

    lead = x.shape[:-1]
    k0 = x.shape[-1]
    M = 1
    for d in lead:
        M *= d
    x2 = x.reshape(M, k0)

    w_shapes = tuple(w.shape for w in packed_weights)
    assert w_shapes[0][0] == k0, (w_shapes[0], k0)
    n_out = w_shapes[-1][1]

    # --- generation-aware tile selection (v5e/v6e: 128 MiB VMEM, v7x: 64 MiB/TC) --- #
    cap = _vmem_capacity_bytes()
    budget = int(0.70 * cap)

    tm = max(8, min(tm_max, _round_up(M, 8)))
    while tm > 8 and _vmem_estimate(tm, k0, w_shapes, n_out) > budget:
        tm = max(8, ((tm // 2) // 8) * 8)

    # Keep both v7x TensorCores busy: for large M guarantee >= 2 (up to 8) grid steps
    # while keeping tiles >= ~512 rows to amortize the ~0.35 us/step overhead.
    if M >= 1024:
        target_steps = max(2, min(8, M // 512))
        tm = min(tm, _round_up(-(-M // target_steps), 8))

    grid = (pl.cdiv(M, tm),)

    est = _vmem_estimate(tm, k0, w_shapes, n_out)
    vmem_limit = int(min(int(0.9 * cap), max(32 * _MiB, est + 16 * _MiB)))

    in_specs = [pl.BlockSpec((tm, k0), lambda i: (i, 0))]              # unpadded x stream
    flat_params = []
    for li in range(num_layers):
        wk, wn = w_shapes[li]
        in_specs.append(pl.BlockSpec((wk, wn), lambda i: (0, 0)))      # resident weight
        in_specs.append(pl.BlockSpec((1, wn), lambda i: (0, 0)))       # resident bias
        flat_params.extend([packed_weights[li], packed_biases[li]])

    kernel = _make_mlp_kernel(num_layers, relu_flags)

    out = pl.pallas_call(
        kernel,
        out_shape=jax.ShapeDtypeStruct((M, n_out), jnp.float32),       # unpadded output, no post-slice
        grid_spec=pltpu.PrefetchScalarGridSpec(
            num_scalar_prefetch=0,
            grid=grid,
            in_specs=in_specs,
            out_specs=pl.BlockSpec((tm, n_out), lambda i: (i, 0)),
        ),
        compiler_params=pltpu.CompilerParams(
            dimension_semantics=("parallel",),                          # shards M across TCs (v7x)
            vmem_limit_bytes=vmem_limit,
        ),
    )(x2, *flat_params)

    return out.reshape(*lead, n_out)


# -------------------------------- reference --------------------------------- #
def mlp_reference(x, weights, biases, relu_flags):
    """Pure-JAX reference with the same bf16-stream / f32-accumulate numerics."""
    lead = x.shape[:-1]
    h = x.reshape(-1, x.shape[-1])
    for w, b, use_relu in zip(weights, biases, relu_flags):
        acc = jnp.dot(h.astype(jnp.bfloat16), w.astype(jnp.bfloat16),
                      preferred_element_type=jnp.float32) + b.astype(jnp.float32)
        if use_relu:
            acc = jnp.maximum(acc, 0.0)
        h = acc
    return h.reshape(*lead, weights[-1].shape[1])


# ----------------------------------- main ------------------------------------ #
if __name__ == "__main__":
    key = jax.random.PRNGKey(0)

    # MLP(in_features=32, dropout_rate=0.0, hidden_unit_sizes=[64, 32],
    #     norm=False, num_classes=8)
    #   -> LinearBlock(32,64) -> LinearBlock(64,32) -> Linear(32,8)
    batch, seq = 2, 8
    in_features = 32
    hidden_unit_sizes = [64, 32]
    num_classes = 8

    sizes = [in_features] + hidden_unit_sizes
    layer_dims = list(zip(sizes[:-1], sizes[1:])) + [(sizes[-1], num_classes)]
    relu_flags = tuple([True] * len(hidden_unit_sizes) + [False])

    keys = jax.random.split(key, 2 * len(layer_dims) + 1)
    x = jax.random.normal(keys[0], (batch, seq, in_features), dtype=jnp.float32)

    weights, biases = [], []
    for li, (fin, fout) in enumerate(layer_dims):
        bound = 1.0 / (fin ** 0.5)               # PyTorch nn.Linear default init range
        w_torch = jax.random.uniform(keys[1 + 2 * li], (fout, fin), jnp.float32, -bound, bound)
        b = jax.random.uniform(keys[2 + 2 * li], (fout,), jnp.float32, -bound, bound)
        weights.append(w_torch.T)                # (in, out) orientation for x @ W
        biases.append(b)
    weights, biases = tuple(weights), tuple(biases)

    # One-time parameter packing (outside the jitted forward).
    packed_ws, packed_bs = pack_mlp_params(weights, biases)
    packed_ws = jax.block_until_ready(packed_ws)

    y = mlp_forward(x, packed_ws, packed_bs, relu_flags)
    y = jax.block_until_ready(y)

    ref = mlp_reference(x, weights, biases, relu_flags)

    assert y.shape == (batch, seq, num_classes), y.shape
    max_err = float(jnp.max(jnp.abs(y - ref)))
    assert jnp.allclose(y, ref, atol=1e-2, rtol=1e-2), max_err

    print("KERNEL_OK")
</pallas_src>

<mosaic_0001>
module attributes {stable_mosaic.version = 11 : i64} {
  func.func @kernel(%arg0: i32, %arg1: memref<16x32xf32, #tpu.memory_space<vmem>>, %arg2: memref<32x128xbf16, #tpu.memory_space<vmem>>, %arg3: memref<1x128xf32, #tpu.memory_space<vmem>>, %arg4: memref<128x128xbf16, #tpu.memory_space<vmem>>, %arg5: memref<1x128xf32, #tpu.memory_space<vmem>>, %arg6: memref<128x8xbf16, #tpu.memory_space<vmem>>, %arg7: memref<1x8xf32, #tpu.memory_space<vmem>>, %arg8: memref<16x8xf32, #tpu.memory_space<vmem>>) attributes {dimension_semantics = [#tpu.dimension_semantics<parallel>], iteration_bounds = array<i64: 1>, scalar_prefetch = 0 : i64, scratch_operands = 0 : i64, tpu.core_type = #tpu.core_type<tc>, window_params = [{transform_indices = @transform_0, window_bounds = array<i64: 16, 32>}, {pipeline_mode = #tpu.pipeline_mode<synchronous>, transform_indices = @transform_1, window_bounds = array<i64: 32, 128>}, {pipeline_mode = #tpu.pipeline_mode<synchronous>, transform_indices = @transform_2, window_bounds = array<i64: 1, 128>}, {pipeline_mode = #tpu.pipeline_mode<synchronous>, transform_indices = @transform_3, window_bounds = array<i64: 128, 128>}, {pipeline_mode = #tpu.pipeline_mode<synchronous>, transform_indices = @transform_4, window_bounds = array<i64: 1, 128>}, {pipeline_mode = #tpu.pipeline_mode<synchronous>, transform_indices = @transform_5, window_bounds = array<i64: 128, 8>}, {pipeline_mode = #tpu.pipeline_mode<synchronous>, transform_indices = @transform_6, window_bounds = array<i64: 1, 8>}, {transform_indices = @transform_7, window_bounds = array<i64: 16, 8>}]} {
    %c0 = arith.constant 0 : index
    %c0_0 = arith.constant 0 : index
    %0 = vector.load %arg1[%c0, %c0_0] : memref<16x32xf32, #tpu.memory_space<vmem>>, vector<16x32xf32>
    %1 = arith.truncf %0 : vector<16x32xf32> to vector<16x32xbf16>
    %c0_1 = arith.constant 0 : index
    %c0_2 = arith.constant 0 : index
    %2 = vector.load %arg2[%c0_1, %c0_2] : memref<32x128xbf16, #tpu.memory_space<vmem>>, vector<32x128xbf16>
    %cst = arith.constant dense<0.000000e+00> : vector<16x128xf32>
    %3 = tpu.matmul %1, %2, %cst {dimension_numbers = #tpu.dot_dimension_numbers<[1], [0], [0], [1], [0, 0, 1, 1], [], []>} : vector<16x32xbf16>, vector<32x128xbf16>, vector<16x128xf32> -> vector<16x128xf32>
    %c0_3 = arith.constant 0 : index
    %c0_4 = arith.constant 0 : index
    %4 = vector.load %arg3[%c0_3, %c0_4] : memref<1x128xf32, #tpu.memory_space<vmem>>, vector<1x128xf32>
    %5 = vector.broadcast %4 : vector<1x128xf32> to vector<16x128xf32>
    %6 = arith.addf %3, %5 : vector<16x128xf32>
    %cst_5 = arith.constant 0.000000e+00 : f32
    %7 = vector.broadcast %cst_5 : f32 to vector<16x128xf32>
    %8 = arith.maximumf %6, %7 : vector<16x128xf32>
    %9 = arith.truncf %8 : vector<16x128xf32> to vector<16x128xbf16>
    %c0_6 = arith.constant 0 : index
    %c0_7 = arith.constant 0 : index
    %10 = vector.load %arg4[%c0_6, %c0_7] : memref<128x128xbf16, #tpu.memory_space<vmem>>, vector<128x128xbf16>
    %cst_8 = arith.constant dense<0.000000e+00> : vector<16x128xf32>
    %11 = tpu.matmul %9, %10, %cst_8 {dimension_numbers = #tpu.dot_dimension_numbers<[1], [0], [0], [1], [0, 0, 1, 1], [], []>} : vector<16x128xbf16>, vector<128x128xbf16>, vector<16x128xf32> -> vector<16x128xf32>
    %c0_9 = arith.constant 0 : index
    %c0_10 = arith.constant 0 : index
    %12 = vector.load %arg5[%c0_9, %c0_10] : memref<1x128xf32, #tpu.memory_space<vmem>>, vector<1x128xf32>
    %13 = vector.broadcast %12 : vector<1x128xf32> to vector<16x128xf32>
    %14 = arith.addf %11, %13 : vector<16x128xf32>
    %cst_11 = arith.constant 0.000000e+00 : f32
    %15 = vector.broadcast %cst_11 : f32 to vector<16x128xf32>
    %16 = arith.maximumf %14, %15 : vector<16x128xf32>
    %17 = arith.truncf %16 : vector<16x128xf32> to vector<16x128xbf16>
    %c0_12 = arith.constant 0 : index
    %c0_13 = arith.constant 0 : index
    %18 = vector.load %arg6[%c0_12, %c0_13] : memref<128x8xbf16, #tpu.memory_space<vmem>>, vector<128x8xbf16>
    %cst_14 = arith.constant dense<0.000000e+00> : vector<16x8xf32>
    %19 = tpu.matmul %17, %18, %cst_14 {dimension_numbers = #tpu.dot_dimension_numbers<[1], [0], [0], [1], [0, 0, 1, 1], [], []>} : vector<16x128xbf16>, vector<128x8xbf16>, vector<16x8xf32> -> vector<16x8xf32>
    %c0_15 = arith.constant 0 : index
    %c0_16 = arith.constant 0 : index
    %20 = vector.load %arg7[%c0_15, %c0_16] : memref<1x8xf32, #tpu.memory_space<vmem>>, vector<1x8xf32>
    %21 = vector.broadcast %20 : vector<1x8xf32> to vector<16x8xf32>
    %22 = arith.addf %19, %21 : vector<16x8xf32>
    %c0_17 = arith.constant 0 : index
    %c0_18 = arith.constant 0 : index
    %23 = vector.load %arg8[%c0_17, %c0_18] : memref<16x8xf32, #tpu.memory_space<vmem>>, vector<16x8xf32>
    tpu.vector_store %arg8[%c0_17, %c0_18], %22 {strides = array<i32>} : memref<16x8xf32, #tpu.memory_space<vmem>>, vector<16x8xf32>,
    return
  }
  func.func @transform_0(%arg0: i32) -> (i32, i32) {
    %c0_i32 = arith.constant 0 : i32
    %c0_i32_0 = arith.constant 0 : i32
    return %arg0, %c0_i32 : i32, i32
  }
  func.func @transform_1(%arg0: i32) -> (i32, i32) {
    %c0_i32 = arith.constant 0 : i32
    %c0_i32_0 = arith.constant 0 : i32
    %c0_i32_1 = arith.constant 0 : i32
    return %c0_i32, %c0_i32_0 : i32, i32
  }
  func.func @transform_2(%arg0: i32) -> (i32, i32) {
    %c0_i32 = arith.constant 0 : i32
    %c0_i32_0 = arith.constant 0 : i32
    %c0_i32_1 = arith.constant 0 : i32
    return %c0_i32, %c0_i32_0 : i32, i32
  }
  func.func @transform_3(%arg0: i32) -> (i32, i32) {
    %c0_i32 = arith.constant 0 : i32
    %c0_i32_0 = arith.constant 0 : i32
    %c0_i32_1 = arith.constant 0 : i32
    return %c0_i32, %c0_i32_0 : i32, i32
  }
  func.func @transform_4(%arg0: i32) -> (i32, i32) {
    %c0_i32 = arith.constant 0 : i32
    %c0_i32_0 = arith.constant 0 : i32
    %c0_i32_1 = arith.constant 0 : i32
    return %c0_i32, %c0_i32_0 : i32, i32
  }
  func.func @transform_5(%arg0: i32) -> (i32, i32) {
    %c0_i32 = arith.constant 0 : i32
    %c0_i32_0 = arith.constant 0 : i32
    %c0_i32_1 = arith.constant 0 : i32
    return %c0_i32, %c0_i32_0 : i32, i32
  }
  func.func @transform_6(%arg0: i32) -> (i32, i32) {
    %c0_i32 = arith.constant 0 : i32
    %c0_i32_0 = arith.constant 0 : i32
    %c0_i32_1 = arith.constant 0 : i32
    return %c0_i32, %c0_i32_0 : i32, i32
  }
  func.func @transform_7(%arg0: i32) -> (i32, i32) {
    %c0_i32 = arith.constant 0 : i32
    %c0_i32_0 = arith.constant 0 : i32
    return %arg0, %c0_i32 : i32, i32
  }
}

</mosaic_0001>

<bundles_post_ra>
// kernel: mlp_forward.1
= control target key start
LH: loop header
LB: loop body
LE: loop exit
PB: predicated region body
PF: predicated region fallthrough
CT: control target
= control target key end

     0   :  { %12 = vsyncpa [#allocation3], 0  ;;  %s707_s0 = inlined_call_operand.hbm [shape: f32[16,32], index: 0, kind: input, shape index: {}]   ;;  %s708_s1 = inlined_call_operand.hbm [shape: bf16[32,128], index: 1, kind: input, shape index: {}]   ;;  %s709_s2 = inlined_call_operand.vmem [shape: f32[1,128], index: 2, kind: input, shape index: {}]   ;;  %s710_s3 = inlined_call_operand.vmem [shape: bf16[128,128], index: 3, kind: input, shape index: {}]   ;;  %s711_s4 = inlined_call_operand.vmem [shape: f32[1,128], index: 4, kind: input, shape index: {}]   ;;  %s712_s5 = inlined_call_operand.vmem [shape: bf16[128,8], index: 5, kind: input, shape index: {}]   ;;  %s713_s6 = inlined_call_operand.vmem [shape: f32[1,8], index: 6, kind: input, shape index: {}]   ;;  %s714_s7 = inlined_call_operand.hbm [shape: f32[16,8], index: 7, kind: output, shape index: {}]  }
   0x1   :  { %13 = vsyncpa [#allocation6], 0 }
   0x2   :  { %14 = vsyncpa [#allocation4], 0  ;;  %s562_s24 = smov [#allocation2]  }
   0x3   :  { %s20_s25 = sshll.u32 %s562_s24, 4  ;;  %s21_s25 = int_to_ptr.vmem [resolvable:$true] %s20_s25 }
   0x4   :  { %s504_s26 = scalar_lea.vmem %s21_s25, 256  ;;  %p509_p1 = scmp.lt.s32.totalorder %s21_s25, %s21_s25 }
   0x5   :  { %p505_p0 = scmp.ne.s32.totalorder %s21_s25, %s504_s26  ;;  %p510_p2 = scmp.lt.s32.totalorder %s504_s26, %s504_s26 }
   0x7   :  { %p511_p3 = por %p510_p2, %p509_p1 }
   0x9   :  { %p512_p4 = pnand %p511_p3, %p505_p0 }
   0xb   :  { %515 = shalt.err (!%p512_p4)
}
   0xc   :  { %s563_s27 = smov 128   ;;  %s564_s28 = smov 8  }
   0xd   :  { %26 = dma.hbm_to_vmem [thread:$0]  %s707_s0, 256, %s21_s25, [#allocation3], %s563_s27, %s563_s27, %s564_s28  }
   0xe   :  { %s565_s8 = smov [#allocation5]  }
   0xf   :  { %s32_s9 = sshll.u32 %s565_s8, 4  ;;  %s33_s9 = int_to_ptr.vmem [resolvable:$true] %s32_s9 }
  0x10   :  { %s524_s10 = scalar_lea.vmem %s33_s9, 256  ;;  %p529_p6 = scmp.lt.s32.totalorder %s33_s9, %s33_s9 }
  0x11   :  { %p525_p5 = scmp.ne.s32.totalorder %s33_s9, %s524_s10  ;;  %p530_p7 = scmp.lt.s32.totalorder %s524_s10, %s524_s10 }
  0x13   :  { %p531_p8 = por %p530_p7, %p529_p6 }
  0x15   :  { %p532_p9 = pnand %p531_p8, %p525_p5 }
  0x17   :  { %535 = shalt.err (!%p532_p9)
}
  0x18   :  { %s566_s11 = smov 64   ;;  %s567_s12 = smov 4  }
  0x19   :  { %38 = dma.hbm_to_vmem [thread:$0]  %s708_s1, 256, %s33_s9, [#allocation6], %s566_s11, %s566_s11, %s567_s12  }
  0x1a   :  { %556 = dma.done.wait [#allocation3], 256  }
  0x1b   :  { %557 = vsyncadd [#allocation3], 4294967040 }
  0x1c   :  { %558 = dma.done.wait [#allocation6], 256  }
  0x1d   :  { %559 = vsyncadd [#allocation6], 4294967040  ;;  %v568_v0 = vmov 0.0   ;;  %vm569_vm0 = vmmov 0   ;;  %v478_v1 = vld [vmem:[#allocation5 + $0x8] sm:$0xff]   ;;  %v479_v2 = vld [vmem:[#allocation5] sm:$0xff]  }
  0x1e   :  { %421 = vmatprep.subr.bf16.mxu0 %v568_v0  ;;  %425 = vmatprep.mubr.msk.bf16.mxu0 %vm569_vm0, %v568_v0  ;;  %v56_v3 = vld [vmem:[#allocation2] sm:$0xff]  ;;  %v57_v4 = vld [vmem:[#allocation2 + $0x8] sm:$0xff]  ;;  %v480_v5 = vld [vmem:[%s710_s3 + $0x38] sm:$0xff]   ;;  %vm82_vm1 = vcmask 261120   ;;  %vm357_vm2 = vcmask 64512  }
  0x1f   :  { %429 = vmatprep.subr.bf16.mxu1 %v568_v0  ;;  %445 = vmatprep.mubr.msk.bf16.mxu1 %vm569_vm0, %v568_v0  ;;  %v58_v6 = vpack.c.bf16 %v57_v4, %v56_v3  ;;  %v481_v7 = vld [vmem:[%s710_s3 + $0x30] sm:$0xff]   ;;  %v482_v8 = vld [vmem:[%s710_s3 + $0x28] sm:$0xff]   ;;  %v483_v9 = vld [vmem:[%s710_s3 + $0x20] sm:$0xff]  }
  0x20   :  { %422 = vmatpush3.bf16.msra.mxu0 %v478_v1  ;;  %430 = vmatpush3.bf16.msra.mxu1 %v480_v5  ;;  %v484_v10 = vld [vmem:[%s710_s3 + $0x18] sm:$0xff]   ;;  %v485_v11 = vld [vmem:[%s710_s3 + $0x10] sm:$0xff]   ;;  %v486_v12 = vld [vmem:[%s710_s3 + $0x8] sm:$0xff]  }
  0x21   :  { %423 = vmatprep.subr.bf16.mxu0 %v568_v0  ;;  %431 = vmatprep.subr.bf16.mxu1 %v568_v0  ;;  %v487_v13 = vld [vmem:[%s710_s3] sm:$0xff]   ;;  %v488_v14 = vld [vmem:[%s712_s5 + $0x38] sm:$0xff]   ;;  %v489_v15 = vld [vmem:[%s712_s5 + $0x30] sm:$0xff]  }
  0x22   :  { %v490_v16 = vld [vmem:[%s712_s5 + $0x28] sm:$0xff]   ;;  %v491_v17 = vld [vmem:[%s712_s5 + $0x20] sm:$0xff]   ;;  %v492_v18 = vld [vmem:[%s712_s5 + $0x18] sm:$0xff]  }
  0x23   :  { %v378_v19 = vld [vmem:[%s709_s2] ss:$0 sm:$0xff]  ;;  %v493_v29 = vld [vmem:[%s712_s5 + $0x10] sm:$0xff]   ;;  %v494_v30 = vld [vmem:[%s712_s5 + $0x8] sm:$0xff]  }
  0x24   :  { %424 = vmatpush3.bf16.msra.mxu0 %v479_v2  ;;  %432 = vmatpush3.bf16.msra.mxu1 %v481_v7  ;;  %v495_v31 = vld [vmem:[%s712_s5] sm:$0xff]   ;;  %s570_s5 = smov [#allocation7]  }
  0x25   :  { %449 = vmatprep.subr.bf16.mxu0 %v568_v0  ;;  %433 = vmatprep.subr.bf16.mxu1 %v568_v0  ;;  %v382_v32 = vld [vmem:[%s711_s4] ss:$0 sm:$0xff]  ;;  %s365_s4 = sshll.u32 %s570_s5, 4  ;;  %s366_s4 = int_to_ptr.vmem [resolvable:$true] %s365_s4 }
  0x26   :  { %v391_v42 = vld [vmem:[%s713_s6] ss:$0 sm:$0xff]  ;;  %s536_s26 = scalar_lea.vmem %s366_s4, 256  ;;  %p541_p11 = scmp.lt.s32.totalorder %s366_s4, %s366_s4 }
  0x27   :  { %426 = vmatmul.mubr.msk.bf16.vlgmr.msra.gmra.mxu0 %vm82_vm1, %v58_v6  ;;  %p537_p10 = scmp.ne.s32.totalorder %s366_s4, %s536_s26  ;;  %p542_p12 = scmp.lt.s32.totalorder %s536_s26, %s536_s26 }
  0x28   :  { %465 = vmatprep.mubr.msk.bf16.mxu0 %vm569_vm0, %v568_v0  ;;  %434 = vmatpush3.bf16.msra.mxu1 %v482_v8 }
  0x29   :  { %435 = vmatprep.subr.bf16.mxu1 %v568_v0  ;;  %450 = vmatpush3.bf16.msra.mxu0 %v488_v14  ;;  %p543_p13 = por %p542_p12, %p541_p11 }
  0x2a   :  { %451 = vmatprep.subr.bf16.mxu0 %v568_v0 }
  0x2b   :  { %p544_p0 = pnand %p543_p13, %p537_p10 }
  0x2c   :  { %436 = vmatpush3.bf16.msra.mxu1 %v483_v9 }
  0x2d   :  { %437 = vmatprep.subr.bf16.mxu1 %v568_v0  ;;  %452 = vmatpush3.bf16.msra.mxu0 %v489_v15 }
  0x2e   :  { %453 = vmatprep.subr.bf16.mxu0 %v568_v0 }
  0x30   :  { %438 = vmatpush3.bf16.msra.mxu1 %v484_v10 }
  0x31   :  { %439 = vmatprep.subr.bf16.mxu1 %v568_v0  ;;  %454 = vmatpush3.bf16.msra.mxu0 %v490_v16 }
  0x32   :  { %455 = vmatprep.subr.bf16.mxu0 %v568_v0 }
  0x34   :  { %440 = vmatpush3.bf16.msra.mxu1 %v485_v11 }
  0x35   :  { %441 = vmatprep.subr.bf16.mxu1 %v568_v0  ;;  %456 = vmatpush3.bf16.msra.mxu0 %v491_v17 }
  0x36   :  { %457 = vmatprep.subr.bf16.mxu0 %v568_v0 }
  0x38   :  { %442 = vmatpush3.bf16.msra.mxu1 %v486_v12 }
  0x39   :  { %443 = vmatprep.subr.bf16.mxu1 %v568_v0  ;;  %458 = vmatpush3.bf16.msra.mxu0 %v492_v18 }
  0x3a   :  { %459 = vmatprep.subr.bf16.mxu0 %v568_v0 }
  0x3c   :  { %444 = vmatpush3.bf16.msra.mxu1 %v487_v13 }
  0x3d   :  { %460 = vmatpush3.bf16.msra.mxu0 %v493_v29 }
  0x3e   :  { %461 = vmatprep.subr.bf16.mxu0 %v568_v0 }
  0x41   :  { %462 = vmatpush3.bf16.msra.mxu0 %v494_v30 }
  0x42   :  { %463 = vmatprep.subr.bf16.mxu0 %v568_v0 }
  0x45   :  { %464 = vmatpush3.bf16.msra.mxu0 %v495_v31 }
  0xe7   :  { %v120_v20 = vpop.f32.mrf.mxu0 }
  0xe8   :  { %v121_v22 = vadd.f32 %v378_v19, %v120_v20 }
  0xe9   :  { %v427_v21 = vpop.f32.mrf.mxu0 }
  0xea   :  { %v127_v26 = vmax.f32 %v121_v22, 0.0 }
  0xeb   :  { %v123_v23 = vpop.f32.mrf.mxu0 }
  0xec   :  { %v124_v24 = vadd.f32 %v378_v19, %v123_v23 }
  0xed   :  { %v428_v25 = vpop.f32.mrf.mxu0 }
  0xee   :  { %v128_v27 = vmax.f32 %v124_v24, 0.0 }
  0xf0   :  { %v129_v28 = vpack.c.bf16 %v128_v27, %v127_v26 }
  0xf2   :  { %446 = vmatmul.mubr.bf16.vlgmr.msra.gmra.mxu1 %v129_v28 }
 0x1b2   :  { %v235_v33 = vpop.f32.mrf.mxu1 }
 0x1b3   :  { %v236_v35 = vadd.f32 %v382_v32, %v235_v33 }
 0x1b4   :  { %v447_v34 = vpop.f32.mrf.mxu1 }
 0x1b5   :  { %v242_v39 = vmax.f32 %v236_v35, 0.0 }
 0x1b6   :  { %v238_v36 = vpop.f32.mrf.mxu1 }
 0x1b7   :  { %v239_v37 = vadd.f32 %v382_v32, %v238_v36 }
 0x1b8   :  { %v448_v38 = vpop.f32.mrf.mxu1 }
 0x1b9   :  { %v243_v40 = vmax.f32 %v239_v37, 0.0 }
 0x1bb   :  { %v244_v41 = vpack.c.bf16 %v243_v40, %v242_v39 }
 0x1bd   :  { %466 = vmatmul.mubr.bf16.vlgmr.msra.gmra.mxu0 %v244_v41 }
 0x27d   :  { %v350_v43 = vpop.f32.mrf.mxu0 }
 0x27e   :  { %v351_v44 = vadd.f32 %v391_v42, %v350_v43 }
 0x27f   :  { %v467_v45 = vpop.f32.mrf.mxu0 }
 0x280   :  { %358 = vst.msk [vmem:[#allocation7] sm:$0xff] %vm357_vm2, %v351_v44 }
 0x281   :  { %v353_v46 = vpop.f32.mrf.mxu0 }
 0x282   :  { %v354_v47 = vadd.f32 %v391_v42, %v353_v46 }
 0x283   :  { %v468_v48 = vpop.f32.mrf.mxu0 }
 0x284   :  { %359 = vst.msk [vmem:[#allocation7 + $0x8] sm:$0xff] %vm357_vm2, %v354_v47 }
 0x285   :  { %547 = shalt.err (!%p544_p0)
}
 0x286   :  { %371 = dma.vmem_to_hbm [thread:$0]  %s366_s4, 256, %s714_s7, [#allocation4], %s563_s27, %s563_s27, %s564_s28  }
 0x287   :  { %560 = dma.done.wait [#allocation4], 256  }
 0x288   :  { %561 = vsyncadd [#allocation4], 4294967040 }
 0x289   :  { %375 = vsyncpa [#allocation3], 1 }
 0x28a   :  { %376 = vsyncpa [#allocation6], 1 }
 0x28b   :  { %377 = vsyncpa [#allocation4], 1 }

</bundles_post_ra>
